<compile_context>
chip_gen: v5e
topology: v5e:2x2
jax: 0.10.0
libtpu: 0.0.40
codegen_flags: <defaults>
</compile_context>

<pallas_src>
import jax
import jax.numpy as jnp
import numpy as np
from jax.experimental import pallas as pl
from jax.experimental.pallas import tpu as pltpu


def _round_up(n, m):
    return ((n + m - 1) // m) * m


def _backbone_classhead_kernel(x_ref, mask_ref, wp_ref, bp_ref,
                               w1_ref, b1_ref, w2_ref, b2_ref,
                               out_ref, acc_ref):
    s_blk = pl.program_id(1)

    @pl.when(s_blk == 0)
    def _init():
        acc_ref[...] = jnp.zeros_like(acc_ref)

    # ---- backbone stand-in: token projection to embedding_dim --------------
    # TODO(synk): FullModel backbone definition is not provided in the source;
    # it is replaced by a single deterministic linear token projection.
    x = x_ref[...]                                            # (TS, F)   bf16
    emb = jnp.dot(x, wp_ref[...],
                  preferred_element_type=jnp.float32) + bp_ref[...]   # (TS, Dp) f32

    # ---- classification_head_linear_embed + ReLU (f32 epilogue) ------------
    h = jnp.dot(emb.astype(jnp.bfloat16), w1_ref[...],
                preferred_element_type=jnp.float32) + b1_ref[...]     # (TS, Dp) f32
    h = jnp.maximum(h, 0.0)

    # ---- masked sum over the sequence axis (partial sum for this block) ----
    # torch: embeddings_sum = sum(relu(linear_embed(emb)) * mask[..., None], dim=1)
    mask = mask_ref[...]                                      # (TS, 1)   f32
    acc_ref[...] += jnp.sum(h * mask, axis=0, keepdims=True)  # (1, Dp)   f32

    # ---- classification_head_linear_class (once per batch element) ---------
    @pl.when(s_blk == pl.num_programs(1) - 1)
    def _finalize():
        logits = jnp.dot(acc_ref[...].astype(jnp.bfloat16), w2_ref[...],
                         preferred_element_type=jnp.float32) + b2_ref[...]
        out_ref[...] = logits                                 # (1, Cp)   f32


def backbone_with_classhead(x, mask, params, *, seq_block=None):
    """Fused forward: backbone projection -> linear+ReLU -> masked sequence sum
    -> linear classifier.  Returns (B, n_out_nodes) float32 logits."""
    B, S, F = x.shape
    D = params["wp"].shape[1]
    C = params["w2"].shape[1]

    LANE = 128
    SUB = 8
    Dp = _round_up(D, LANE)
    Cp = _round_up(C, LANE)

    # Sequence tiling: 8-aligned block, sequence zero-padded to a multiple of
    # the block (padded tokens have mask == 0 so the result is unchanged).
    if seq_block is None:
        seq_block = 512
    seq_block = _round_up(max(SUB, min(seq_block, _round_up(S, SUB))), SUB)
    Sp = _round_up(S, seq_block)
    n_sblk = Sp // seq_block

    f32, bf16 = jnp.float32, jnp.bfloat16

    # Zero-padding the lane dims keeps the math exact (all padded columns of
    # every intermediate stay exactly zero) and makes matmuls/stores lane-dense.
    wp = jnp.pad(params["wp"].astype(f32), ((0, 0), (0, Dp - D))).astype(bf16)
    bp = jnp.pad(params["bp"].astype(f32), ((0, 0), (0, Dp - D)))
    w1 = jnp.pad(params["w1"].astype(f32), ((0, Dp - D), (0, Dp - D))).astype(bf16)
    b1 = jnp.pad(params["b1"].astype(f32), ((0, 0), (0, Dp - D)))
    w2 = jnp.pad(params["w2"].astype(f32), ((0, Dp - D), (0, Cp - C))).astype(bf16)
    b2 = jnp.pad(params["b2"].astype(f32), ((0, 0), (0, Cp - C)))

    x_bf = x.astype(bf16)                       # halve HBM/VMEM traffic for x
    mask3 = mask.astype(f32)[:, :, None]        # (B, S, 1)
    if Sp != S:
        x_bf = jnp.pad(x_bf, ((0, 0), (0, Sp - S), (0, 0)))
        mask3 = jnp.pad(mask3, ((0, 0), (0, Sp - S), (0, 0)))

    grid = (B, n_sblk)                          # batch parallel, seq = reduction

    in_specs = [
        pl.BlockSpec((None, seq_block, F), lambda b, s: (b, s, 0)),   # x (pipelined)
        pl.BlockSpec((None, seq_block, 1), lambda b, s: (b, s, 0)),   # mask (pipelined)
        pl.BlockSpec((F, Dp),  lambda b, s: (0, 0)),                  # wp (resident)
        pl.BlockSpec((1, Dp),  lambda b, s: (0, 0)),                  # bp
        pl.BlockSpec((Dp, Dp), lambda b, s: (0, 0)),                  # w1
        pl.BlockSpec((1, Dp),  lambda b, s: (0, 0)),                  # b1
        pl.BlockSpec((Dp, Cp), lambda b, s: (0, 0)),                  # w2
        pl.BlockSpec((1, Cp),  lambda b, s: (0, 0)),                  # b2
    ]
    out_spec = pl.BlockSpec((None, 1, Cp), lambda b, s: (b, 0, 0))

    flops = 2 * B * Sp * (F * Dp + Dp * Dp) + 2 * B * Dp * Cp + 3 * B * Sp * Dp
    bytes_accessed = (x_bf.size * 2 + mask3.size * 4
                      + (wp.size + w1.size + w2.size) * 2
                      + (bp.size + b1.size + b2.size) * 4
                      + B * Cp * 4)
    cost = pl.CostEstimate(flops=int(flops), transcendentals=0,
                           bytes_accessed=int(bytes_accessed))

    # VMEM budget: 2x (double-buffered) activation blocks + resident weights +
    # in-kernel (TS, Dp) f32 intermediates + accumulator/output.
    act_blk = seq_block * F * 2 + seq_block * 4
    w_bytes = (wp.size + w1.size + w2.size) * 2 + (bp.size + b1.size + b2.size) * 4
    est_vmem = 2 * act_blk + w_bytes + 3 * seq_block * Dp * 4 + (Dp + 2 * Cp) * 4
    cp_kwargs = dict(dimension_semantics=("parallel", "arbitrary"))
    if est_vmem > 16 * 1024 * 1024:
        # Stay well inside v7x's 64 MiB physical VMEM per TensorCore.
        cp_kwargs["vmem_limit_bytes"] = int(min(2 * est_vmem, 48 * 1024 * 1024))

    logits_padded = pl.pallas_call(
        _backbone_classhead_kernel,
        out_shape=jax.ShapeDtypeStruct((B, 1, Cp), f32),
        grid=grid,
        in_specs=in_specs,
        out_specs=out_spec,
        scratch_shapes=[pltpu.VMEM((1, Dp), f32)],
        compiler_params=pltpu.CompilerParams(**cp_kwargs),
        cost_estimate=cost,
    )(x_bf, mask3, wp, bp, w1, b1, w2, b2)

    return logits_padded.reshape(B, Cp)[:, :C]


def reference_forward(x, mask, params):
    """Pure-JAX reference mirroring the kernel's bf16-operand / f32-accum math."""
    wp = params["wp"].astype(jnp.bfloat16)
    w1 = params["w1"].astype(jnp.bfloat16)
    w2 = params["w2"].astype(jnp.bfloat16)
    emb = jnp.einsum("bsf,fd->bsd", x.astype(jnp.bfloat16), wp,
                     preferred_element_type=jnp.float32) + params["bp"]
    h = jnp.einsum("bsd,de->bse", emb.astype(jnp.bfloat16), w1,
                   preferred_element_type=jnp.float32) + params["b1"]
    h = jax.nn.relu(h)
    s = jnp.sum(h * mask[:, :, None], axis=1)
    return jnp.dot(s.astype(jnp.bfloat16), w2,
                   preferred_element_type=jnp.float32) + params["b2"]


def make_params(key, f_in, embedding_dim, n_out_nodes):
    ks = jax.random.split(key, 6)
    scale_p = 1.0 / np.sqrt(f_in)
    scale_1 = 1.0 / np.sqrt(embedding_dim)
    return {
        "wp": jax.random.normal(ks[0], (f_in, embedding_dim), jnp.float32) * scale_p,
        "bp": jax.random.normal(ks[1], (1, embedding_dim), jnp.float32) * 0.1,
        "w1": jax.random.normal(ks[2], (embedding_dim, embedding_dim), jnp.float32) * scale_1,
        "b1": jax.random.normal(ks[3], (1, embedding_dim), jnp.float32) * 0.1,
        "w2": jax.random.normal(ks[4], (embedding_dim, n_out_nodes), jnp.float32) * scale_1,
        "b2": jax.random.normal(ks[5], (1, n_out_nodes), jnp.float32) * 0.1,
    }


if __name__ == "__main__":
    B, S, F_IN = 2, 16, 4      # batch, sequence length, raw token features
    D, C = 32, 2               # embedding_dim, n_out_nodes

    key = jax.random.PRNGKey(0)
    k_x, k_p = jax.random.split(key)

    x = jax.random.normal(k_x, (B, S, F_IN), jnp.float32)
    # deterministic validity mask: first event keeps 10 tokens, second keeps all 16
    lengths = jnp.array([[10], [16]], dtype=jnp.int32)
    mask = (jnp.arange(S)[None, :] < lengths).astype(jnp.float32)   # (B, S)

    params = make_params(k_p, F_IN, D, C)

    # seq_block=8 exercises the multi-block sequence-reduction / accumulator path.
    logits = backbone_with_classhead(x, mask, params, seq_block=8)
    logits = jax.block_until_ready(logits)

    ref = reference_forward(x, mask, params)
    assert logits.shape == (B, C)
    np.testing.assert_allclose(np.asarray(logits), np.asarray(ref),
                               rtol=1e-2, atol=2e-2)
    print("KERNEL_OK")
</pallas_src>

<mosaic_0001>
module attributes {stable_mosaic.version = 11 : i64} {
  func.func @_backbone_classhead_kernel(%arg0: i32, %arg1: i32, %arg2: memref<1x8x4xbf16, #tpu.memory_space<vmem>>, %arg3: memref<1x8x1xf32, #tpu.memory_space<vmem>>, %arg4: memref<4x128xbf16, #tpu.memory_space<vmem>>, %arg5: memref<1x128xf32, #tpu.memory_space<vmem>>, %arg6: memref<128x128xbf16, #tpu.memory_space<vmem>>, %arg7: memref<1x128xf32, #tpu.memory_space<vmem>>, %arg8: memref<128x128xbf16, #tpu.memory_space<vmem>>, %arg9: memref<1x128xf32, #tpu.memory_space<vmem>>, %arg10: memref<1x1x128xf32, #tpu.memory_space<vmem>>, %arg11: memref<1x128xf32, #tpu.memory_space<vmem>>) attributes {dimension_semantics = [#tpu.dimension_semantics<parallel>, #tpu.dimension_semantics<arbitrary>], iteration_bounds = array<i64: 2, 2>, scalar_prefetch = 0 : i64, scratch_operands = 1 : i64, tpu.core_type = #tpu.core_type<tc>, window_params = [{transform_indices = @transform_0, window_bounds = array<i64: 1, 8, 4>}, {transform_indices = @transform_1, window_bounds = array<i64: 1, 8, 1>}, {pipeline_mode = #tpu.pipeline_mode<synchronous>, transform_indices = @transform_2, window_bounds = array<i64: 4, 128>}, {pipeline_mode = #tpu.pipeline_mode<synchronous>, transform_indices = @transform_3, window_bounds = array<i64: 1, 128>}, {pipeline_mode = #tpu.pipeline_mode<synchronous>, transform_indices = @transform_4, window_bounds = array<i64: 128, 128>}, {pipeline_mode = #tpu.pipeline_mode<synchronous>, transform_indices = @transform_5, window_bounds = array<i64: 1, 128>}, {pipeline_mode = #tpu.pipeline_mode<synchronous>, transform_indices = @transform_6, window_bounds = array<i64: 128, 128>}, {pipeline_mode = #tpu.pipeline_mode<synchronous>, transform_indices = @transform_7, window_bounds = array<i64: 1, 128>}, {transform_indices = @transform_8, window_bounds = array<i64: 1, 1, 128>}]} {
    %c0_i32 = arith.constant 0 : i32
    %0 = arith.cmpi eq, %arg1, %c0_i32 : i32
    %1 = arith.extui %0 : i1 to i32
    %c0_i32_0 = arith.constant 0 : i32
    %2 = arith.cmpi ne, %1, %c0_i32_0 : i32
    scf.if %2 {
      %cst_22 = arith.constant 0.000000e+00 : f32
      %30 = vector.broadcast %cst_22 : f32 to vector<1x128xf32>
      %c0_23 = arith.constant 0 : index
      %c0_24 = arith.constant 0 : index
      %31 = vector.load %arg11[%c0_23, %c0_24] : memref<1x128xf32, #tpu.memory_space<vmem>>, vector<1x128xf32>
      tpu.vector_store %arg11[%c0_23, %c0_24], %30 {strides = array<i32>} : memref<1x128xf32, #tpu.memory_space<vmem>>, vector<1x128xf32>,
    } else {
    }
    %c0 = arith.constant 0 : index
    %c0_1 = arith.constant 0 : index
    %c0_2 = arith.constant 0 : index
    %3 = vector.load %arg2[%c0, %c0_1, %c0_2] : memref<1x8x4xbf16, #tpu.memory_space<vmem>>, vector<1x8x4xbf16>
    %4 = vector.shape_cast %3 : vector<1x8x4xbf16> to vector<8x4xbf16>
    %c0_3 = arith.constant 0 : index
    %c0_4 = arith.constant 0 : index
    %5 = vector.load %arg4[%c0_3, %c0_4] : memref<4x128xbf16, #tpu.memory_space<vmem>>, vector<4x128xbf16>
    %cst = arith.constant dense<0.000000e+00> : vector<8x128xf32>
    %6 = tpu.matmul %4, %5, %cst {dimension_numbers = #tpu.dot_dimension_numbers<[1], [0], [0], [1], [0, 0, 1, 1], [], []>} : vector<8x4xbf16>, vector<4x128xbf16>, vector<8x128xf32> -> vector<8x128xf32>
    %c0_5 = arith.constant 0 : index
    %c0_6 = arith.constant 0 : index
    %7 = vector.load %arg5[%c0_5, %c0_6] : memref<1x128xf32, #tpu.memory_space<vmem>>, vector<1x128xf32>
    %8 = vector.broadcast %7 : vector<1x128xf32> to vector<8x128xf32>
    %9 = arith.addf %6, %8 : vector<8x128xf32>
    %10 = arith.truncf %9 : vector<8x128xf32> to vector<8x128xbf16>
    %c0_7 = arith.constant 0 : index
    %c0_8 = arith.constant 0 : index
    %11 = vector.load %arg6[%c0_7, %c0_8] : memref<128x128xbf16, #tpu.memory_space<vmem>>, vector<128x128xbf16>
    %cst_9 = arith.constant dense<0.000000e+00> : vector<8x128xf32>
    %12 = tpu.matmul %10, %11, %cst_9 {dimension_numbers = #tpu.dot_dimension_numbers<[1], [0], [0], [1], [0, 0, 1, 1], [], []>} : vector<8x128xbf16>, vector<128x128xbf16>, vector<8x128xf32> -> vector<8x128xf32>
    %c0_10 = arith.constant 0 : index
    %c0_11 = arith.constant 0 : index
    %13 = vector.load %arg7[%c0_10, %c0_11] : memref<1x128xf32, #tpu.memory_space<vmem>>, vector<1x128xf32>
    %14 = vector.broadcast %13 : vector<1x128xf32> to vector<8x128xf32>
    %15 = arith.addf %12, %14 : vector<8x128xf32>
    %cst_12 = arith.constant 0.000000e+00 : f32
    %16 = vector.broadcast %cst_12 : f32 to vector<8x128xf32>
    %17 = arith.maximumf %15, %16 : vector<8x128xf32>
    %c0_13 = arith.constant 0 : index
    %c0_14 = arith.constant 0 : index
    %c0_15 = arith.constant 0 : index
    %18 = vector.load %arg3[%c0_13, %c0_14, %c0_15] : memref<1x8x1xf32, #tpu.memory_space<vmem>>, vector<1x8x1xf32>
    %19 = vector.shape_cast %18 : vector<1x8x1xf32> to vector<8x1xf32>
    %c0_16 = arith.constant 0 : index
    %c0_17 = arith.constant 0 : index
    %20 = vector.load %arg11[%c0_16, %c0_17] : memref<1x128xf32, #tpu.memory_space<vmem>>, vector<1x128xf32>
    %21 = vector.broadcast %19 : vector<8x1xf32> to vector<8x128xf32>
    %22 = arith.mulf %17, %21 : vector<8x128xf32>
    %cst_18 = arith.constant dense<0.000000e+00> : vector<128xf32>
    %23 = vector.multi_reduction <add>, %22, %cst_18 [0] : vector<8x128xf32> to vector<128xf32>
    %24 = vector.shape_cast %23 : vector<128xf32> to vector<1x128xf32>
    %25 = arith.addf %20, %24 : vector<1x128xf32>
    %c0_19 = arith.constant 0 : index
    %c0_20 = arith.constant 0 : index
    %26 = vector.load %arg11[%c0_19, %c0_20] : memref<1x128xf32, #tpu.memory_space<vmem>>, vector<1x128xf32>
    tpu.vector_store %arg11[%c0_19, %c0_20], %25 {strides = array<i32>} : memref<1x128xf32, #tpu.memory_space<vmem>>, vector<1x128xf32>,
    %c1_i32 = arith.constant 1 : i32
    %27 = arith.cmpi eq, %arg1, %c1_i32 : i32
    %28 = arith.extui %27 : i1 to i32
    %c0_i32_21 = arith.constant 0 : i32
    %29 = arith.cmpi ne, %28, %c0_i32_21 : i32
    scf.if %29 {
      %c0_22 = arith.constant 0 : index
      %c0_23 = arith.constant 0 : index
      %30 = vector.load %arg11[%c0_22, %c0_23] : memref<1x128xf32, #tpu.memory_space<vmem>>, vector<1x128xf32>
      %31 = arith.truncf %30 : vector<1x128xf32> to vector<1x128xbf16>
      %c0_24 = arith.constant 0 : index
      %c0_25 = arith.constant 0 : index
      %32 = vector.load %arg8[%c0_24, %c0_25] : memref<128x128xbf16, #tpu.memory_space<vmem>>, vector<128x128xbf16>
      %cst_26 = arith.constant dense<0.000000e+00> : vector<1x128xf32>
      %33 = tpu.matmul %31, %32, %cst_26 {dimension_numbers = #tpu.dot_dimension_numbers<[1], [0], [0], [1], [0, 0, 1, 1], [], []>} : vector<1x128xbf16>, vector<128x128xbf16>, vector<1x128xf32> -> vector<1x128xf32>
      %c0_27 = arith.constant 0 : index
      %c0_28 = arith.constant 0 : index
      %34 = vector.load %arg9[%c0_27, %c0_28] : memref<1x128xf32, #tpu.memory_space<vmem>>, vector<1x128xf32>
      %35 = arith.addf %33, %34 : vector<1x128xf32>
      %c0_29 = arith.constant 0 : index
      %c0_30 = arith.constant 0 : index
      %c0_31 = arith.constant 0 : index
      %36 = vector.load %arg10[%c0_29, %c0_30, %c0_31] : memref<1x1x128xf32, #tpu.memory_space<vmem>>, vector<1x1x128xf32>
      %37 = vector.shape_cast %36 : vector<1x1x128xf32> to vector<1x128xf32>
      %38 = vector.shape_cast %35 : vector<1x128xf32> to vector<1x1x128xf32>
      tpu.vector_store %arg10[%c0_29, %c0_30, %c0_31], %38 {strides = array<i32>} : memref<1x1x128xf32, #tpu.memory_space<vmem>>, vector<1x1x128xf32>,
    } else {
    }
    return
  }
  func.func @transform_0(%arg0: i32, %arg1: i32) -> (i32, i32, i32) {
    %c0_i32 = arith.constant 0 : i32
    %c0_i32_0 = arith.constant 0 : i32
    return %arg0, %arg1, %c0_i32 : i32, i32, i32
  }
  func.func @transform_1(%arg0: i32, %arg1: i32) -> (i32, i32, i32) {
    %c0_i32 = arith.constant 0 : i32
    %c0_i32_0 = arith.constant 0 : i32
    return %arg0, %arg1, %c0_i32 : i32, i32, i32
  }
  func.func @transform_2(%arg0: i32, %arg1: i32) -> (i32, i32) {
    %c0_i32 = arith.constant 0 : i32
    %c0_i32_0 = arith.constant 0 : i32
    %c0_i32_1 = arith.constant 0 : i32
    return %c0_i32, %c0_i32_0 : i32, i32
  }
  func.func @transform_3(%arg0: i32, %arg1: i32) -> (i32, i32) {
    %c0_i32 = arith.constant 0 : i32
    %c0_i32_0 = arith.constant 0 : i32
    %c0_i32_1 = arith.constant 0 : i32
    return %c0_i32, %c0_i32_0 : i32, i32
  }
  func.func @transform_4(%arg0: i32, %arg1: i32) -> (i32, i32) {
    %c0_i32 = arith.constant 0 : i32
    %c0_i32_0 = arith.constant 0 : i32
    %c0_i32_1 = arith.constant 0 : i32
    return %c0_i32, %c0_i32_0 : i32, i32
  }
  func.func @transform_5(%arg0: i32, %arg1: i32) -> (i32, i32) {
    %c0_i32 = arith.constant 0 : i32
    %c0_i32_0 = arith.constant 0 : i32
    %c0_i32_1 = arith.constant 0 : i32
    return %c0_i32, %c0_i32_0 : i32, i32
  }
  func.func @transform_6(%arg0: i32, %arg1: i32) -> (i32, i32) {
    %c0_i32 = arith.constant 0 : i32
    %c0_i32_0 = arith.constant 0 : i32
    %c0_i32_1 = arith.constant 0 : i32
    return %c0_i32, %c0_i32_0 : i32, i32
  }
  func.func @transform_7(%arg0: i32, %arg1: i32) -> (i32, i32) {
    %c0_i32 = arith.constant 0 : i32
    %c0_i32_0 = arith.constant 0 : i32
    %c0_i32_1 = arith.constant 0 : i32
    return %c0_i32, %c0_i32_0 : i32, i32
  }
  func.func @transform_8(%arg0: i32, %arg1: i32) -> (i32, i32, i32) {
    %c0_i32 = arith.constant 0 : i32
    %c0_i32_0 = arith.constant 0 : i32
    %c0_i32_1 = arith.constant 0 : i32
    return %arg0, %c0_i32, %c0_i32_0 : i32, i32, i32
  }
}

</mosaic_0001>

<bundles_post_ra>
// kernel: tpu_custom_call.1
= control target key start
LH: loop header
LB: loop body
LE: loop exit
PB: predicated region body
PF: predicated region fallthrough
CT: control target
= control target key end

     0   :  { %13 = vsyncpa [#allocation4], 0  ;;  %s1317_s0 = inlined_call_operand.vmem [shape: bf16[2,16,4], index: 0, kind: input, shape index: {}]   ;;  %s1318_s1 = inlined_call_operand.vmem [shape: f32[2,16,1], index: 1, kind: input, shape index: {}]   ;;  %s1319_s2 = inlined_call_operand.vmem [shape: bf16[4,128], index: 2, kind: input, shape index: {}]   ;;  %s1320_s3 = inlined_call_operand.vmem [shape: f32[1,128], index: 3, kind: input, shape index: {}]   ;;  %s1321_s4 = inlined_call_operand.hbm [shape: bf16[128,128], index: 4, kind: input, shape index: {}]   ;;  %s1322_s5 = inlined_call_operand.vmem [shape: f32[1,128], index: 5, kind: input, shape index: {}]   ;;  %s1323_s6 = inlined_call_operand.hbm [shape: bf16[128,128], index: 6, kind: input, shape index: {}]   ;;  %s1324_s7 = inlined_call_operand.vmem [shape: f32[1,128], index: 7, kind: input, shape index: {}]   ;;  %s1325_s8 = inlined_call_operand.hbm [shape: f32[2,1,128], index: 8, kind: output, shape index: {}]  }
   0x1   :  { %14 = vsyncpa [#allocation7], 0 }
   0x2   :  { %15 = vsyncpa [#allocation5], 0 }
   0x3   :  { %17 = vsyncpa [#allocation5 + $0x1], 0  ;;  %s1145_s27 = smov 0   ;;  %s1147_s28 = smov 0  }
   0x4   :  { %s1149_s29 = smov 0   ;;  %s1151_s30 = smov 0  }
   0x5   :  { %s1153_s9 = smov 0   ;;  %s1155_s10 = smov 0  }
   0x6   :  { %s1157_s11 = smov 0   ;;  %s1159_s12 = smov 0  }
   0x7 LB: > { %1330 = sst [smem:[#allocation12_spill]] %s1084_s10  ;;  %s733_s13 = sadd.s32 4294967295, %s1092_s12   ;;  %s1092_s12 = sphi %s1159_s12, %s23_s12   ;;  %s1088_s11 = sphi %s1157_s11, %s1343_s11   ;;  %s1084_s10 = sphi %s1155_s10, %s1342_s10   ;;  %s1080_s9 = sphi %s1153_s9, %s1341_s9   ;;  %s1076_s30 = sphi %s1151_s30, %s1340_s30   ;;  %s1072_s29 = sphi %s1149_s29, %s1346_s29   ;;  %s1068_s28 = sphi %s1147_s28, %s1345_s28   ;;  %s1064_s27 = sphi %s1145_s27, %s1344_s27  }
   0x8   : > { %1331 = sst [smem:[#allocation13_spill]] %s1088_s11  ;;  %s734_s14 = sadd.s32 4294967294, %s1092_s12  }
   0x9   : > { %s32_s15 = sadd.s32 1, %s1084_s10  ;;  %s35_s16 = sadd.s32 1, %s1088_s11 }
   0xa   : > { %p33_p0 = scmp.ge.s32.totalorder %s32_s15, 2  ;;  %s224_s17 = sadd.s32 1, %s1072_s29 }
   0xb   : > { %p234_p1 = scmp.ne.s32.totalorder %s1072_s29, %s1068_s28  ;;  %p235_p2 = scmp.eq.s32.totalorder %s733_s13, 3 }
   0xc   : > { %s1348_s15 = smov (%p33_p0, %s32_s15), 0  ;;  %s1350_s16 = smov (!%p33_p0, %s35_s16), %s1088_s11 }
   0xd   : > { %1332 = sst [smem:[#allocation14_spill]] %s1348_s15  ;;  %p1195_p3 = por %p235_p2, %p234_p1 }
   0xe   : > { %p240_p4 = scmp.ne.s32.totalorder %s1068_s28, %s1064_s27  ;;  %p37_p5 = scmp.ge.s32.totalorder %s1350_s16, 2 }
   0xf   : > { %p241_p6 = scmp.eq.s32.totalorder %s734_s14, 3  ;;  %p735_p7 = scmp.ge.s32.totalorder %s1092_s12, 1 }
  0x10   : > { %p248_p8 = scmp.lt.s32.totalorder %s1092_s12, 5  ;;  %s1352_s16 = smov (%p37_p5, %s1350_s16), 0 }
  0x11   : > { %1334 = sst [smem:[#allocation15_spill]] %s1352_s16  ;;  %p1205_p9 = por %p241_p6, %p240_p4 }
  0x12   : > { %p1209_p10 = pnand %p735_p7, %p248_p8  ;;  %s221_s21 = ssub.s32 %s1088_s11, %s1352_s16 }
  0x13   : > { %s1335_s19 = scalar_select %p1205_p9, 1, 0 }
  0x14   : > { %p222_p11 = scmp.eq.s32.totalorder %s221_s21, 0  ;;  %p841_p12 = pneg %p1209_p10 }
  0x15   : > { %1336 = sst [smem:[#allocation16_spill]] %s1335_s19  ;;  %p1217_p13 = scmp.eq.s32.totalorder %s733_s13, 0 }
  0x16   : > { %s265_s25 = sshll.u32 %s1321_s4, 4  ;;  %s1094_s14 = smov [#allocation3]   ;;  %s266_s25 = int_to_ptr.hbm [resolvable:$true] %s265_s25 }
  0x17   : > { %s1225_s26 = scalar_select %p222_p11, %s1072_s29, %s224_s17  }
  0x18   : > { %s267_s15 = sshll.u32 %s1094_s14, 4  ;;  %p842_p0 = pnand %p1217_p13, %p841_p12  ;;  %s268_s15 = int_to_ptr.vmem [resolvable:$true] %s267_s15 }
  0x19   : > { %s1095_s21 = smov 64   ;;  %s1096_s16 = smov 4  }
  0x1a   : > { %844 = dma.hbm_to_vmem [thread:$0]  (!%p842_p0), %s266_s25, 1024, %s268_s15, [#allocation4], %s1095_s21, %s1095_s21, %s1096_s16  }
  0x1b   : > { %s282_s10 = sshll.u32 %s1323_s6, 4  ;;  %s1097_s19 = smov [#allocation6]   ;;  %s283_s10 = int_to_ptr.hbm [resolvable:$true] %s282_s10 }
  0x1c   : > { %s284_s23 = sshll.u32 %s1097_s19, 4  ;;  %325 = sbr.rel (%p1209_p10) target bundleno = 513 (0x201), region = 52  ;;  %s285_s23 = int_to_ptr.vmem [resolvable:$true] %s284_s23 }
  0x1d   : > { %847 = dma.hbm_to_vmem [thread:$0]  (!%p842_p0), %s283_s10, 1024, %s285_s23, [#allocation7], %s1095_s21, %s1095_s21, %s1096_s16  }
  0x21   : > { %1051 = dma.done.wait (%p1217_p13), [#allocation4], 1024  }
  0x22   : > { %1053 = vsyncadd (%p1217_p13), [#allocation4], 4294966272 }
  0x23   : > { %1055 = dma.done.wait (%p1217_p13), [#allocation7], 1024  }
  0x24   : > { %1057 = vsyncadd (%p1217_p13), [#allocation7], 4294966272  ;;  %s373_s10 = sand.u32 1, %s1068_s28   ;;  %p375_p1 = scmp.lt.s32.totalorder %s1080_s9, 1 }
  0x25   : > { %p377_p2 = scmp.lt.s32.totalorder %s1076_s30, 1  ;;  %s1255_s23 = scalar_lea.vmem [#allocation8], %s373_s10 }
  0x26   : > { %s376_s11 = scalar_select %p375_p1, %s1080_s9, 1 }
  0x27   : > { %s378_s15 = scalar_select %p377_p2, %s1076_s30, 1 }
  0x28   : > { %s742_s16 = sshll.u32 %s376_s11, 1  ;;  %p746_p4 = scmp.ne.s32.totalorder %s1076_s30, 0 }
  0x29   : > { %s380_s17 = sadd.s32 %s742_s16, %s378_s15 }
  0x2a   : > { %s743_s19 = sshll.u32 %s380_s17, 2  ;;  %s745_s20 = sshll.u32 %s380_s17, 3 }
  0x2b   : > { %s382_s22 = scalar_lea.vmem %s1317_s0, %s743_s19  ;;  %s390_s13 = scalar_lea.vmem %s1318_s1, %s745_s20 }
  0x2c   : > { %395 = sbr.rel (%p746_p4) target bundleno = 51 (0x33), region = 64 }
  0x31   : > { %v1098_v0 = vmov 0.0  }
  0x32   : > { %396 = vst [vmem:[#allocation2] sm:$0x1] %v1098_v0 }
  0x33 PF: > { %v398_v1 = vld [vmem:[%s1319_s2] sm:$0x3]  ;;  %vm407_vm0 = vcmask 1041408   ;;  %vm403_vm1 = vcmask 31744   ;;  %v821_v5 = vld [vmem:[#allocation3 + $0x30] sm:$0xff]  ;;  %v820_v6 = vld [vmem:[#allocation3 + $0x28] sm:$0xff] }
  0x34   : > { %v409_v2 = vsel %vm407_vm0, %v398_v1, 0  ;;  %v822_v3 = vld [vmem:[#allocation3 + $0x38] sm:$0xff]  ;;  %v819_v7 = vld [vmem:[#allocation3 + $0x20] sm:$0xff]  ;;  %v817_v9 = vld [vmem:[#allocation3 + $0x10] sm:$0xff]  ;;  %v1099_v13 = vmov 0   ;;  %p780_p5 = scmp.ne.s32.totalorder %s1076_s30, 1 }
  0x35   : > { %418 = vmatpush.bf16.msra.mxu0 %v409_v2  ;;  %v397_v4 = vld [vmem:[%s382_s22] sm:$0xf]  ;;  %493 = vmatpush.bf16.msra.mxu1 %v822_v3  ;;  %v816_v10 = vld [vmem:[#allocation3 + $0x8] sm:$0xff] }
  0x36   : > { %v818_v8 = vld [vmem:[#allocation3 + $0x18] sm:$0xff]  ;;  %v815_v11 = vld [vmem:[#allocation3] sm:$0xff]  ;;  %927 = vset.pattern.permute.xlu0 %v1099_v13 }
  0x37   : > { %v507_v12 = vld [vmem:[%s390_s13] sm:$0xff] }
  0x38   : > { %747 = vmatmul.msk.bf16.vlgmr.msra.gmra.mxu0 %vm403_vm1, %v397_v4  ;;  %511 = vperm.xlu0 %927, %v507_v12   ;;  %v928_v14 = vld [vmem:[%s1320_s3] ss:$0 sm:$0xff] }
  0x39   : > { %494 = vmatpush.bf16.msra.mxu1 %v821_v5  ;;  %v929_v19 = vld [vmem:[%s1322_s5] ss:$0 sm:$0xff] }
  0x3a   : > { %v508_v31 = vld [vmem:[#allocation2] sm:$0x1] }
  0x3d   : > { %495 = vmatpush.bf16.msra.mxu1 %v820_v6 }
  0x41   : > { %496 = vmatpush.bf16.msra.mxu1 %v819_v7 }
  0x45   : > { %497 = vmatpush.bf16.msra.mxu1 %v818_v8 }
  0x49   : > { %498 = vmatpush.bf16.msra.mxu1 %v817_v9 }
  0x4d   : > { %499 = vmatpush.bf16.msra.mxu1 %v816_v10 }
  0x51   : > { %500 = vmatpush.bf16.msra.mxu1 %v815_v11 }
  0xaa   : > { %v512_v22 = vpop.permute.xlu0 %511 }
  0xb5   : > { %v420_v15 = vpop.f32.mrf.mxu0 }
  0xb6   : > { %v421_v16 = vadd.f32 %v928_v14, %v420_v15 }
  0xb8   : > { %v424_v17 = vpack.c.bf16 %v421_v16, %v421_v16 }
  0xba   : > { %501 = vmatmul.bf16.vlgmr.msra.gmra.mxu1 %v424_v17 }
  0xbd   : > { %v422_v18 = vpop.f32.mrf.mxu0 }
 0x137   : > { %v502_v20 = vpop.f32.mrf.mxu1 }
 0x138   : > { %v503_v21 = vadd.f32 %v929_v19, %v502_v20 }
 0x13a   : > { %v506_v23 = vmax.f32 %v503_v21, 0.0 }
 0x13c   : > { %v514_v24 = vmul.f32 %v512_v22, %v506_v23 }
 0x13e   : > { %v515_v25 = vrot.slane %v514_v24, 4 }
 0x13f   : > { %v504_v26 = vpop.f32.mrf.mxu1 }
 0x140   : > { %v516_v27 = vadd.f32 %v515_v25, %v514_v24 }
 0x142   : > { %v517_v28 = vrot.slane %v516_v27, 2 }
 0x144   : > { %v518_v29 = vadd.f32 %v517_v28, %v516_v27 }
 0x146   : > { %v519_v30 = vrot.slane %v518_v29, 1 }
 0x148   : > { %v520_v32 = vadd.f32 %v519_v30, %v518_v29  ;;  %526 = sbr.rel (%p780_p5) target bundleno = 499 (0x1f3), region = 68 }
 0x14a   : > { %v521_v33 = vadd.f32 %v520_v32, %v508_v31 }
 0x14c   : > { %522 = vst [vmem:[#allocation2] sm:$0x1] %v521_v33 }
 0x14d   : > { %v830_v34 = vld [vmem:[#allocation6 + $0x38] sm:$0xff]  ;;  %v829_v35 = vld [vmem:[#allocation6 + $0x30] sm:$0xff]  ;;  %v828_v36 = vld [vmem:[#allocation6 + $0x28] sm:$0xff] }
 0x14e   : > { %594 = vmatpush.bf16.msra.mxu0 %v830_v34  ;;  %v827_v37 = vld [vmem:[#allocation6 + $0x20] sm:$0xff]  ;;  %v826_v38 = vld [vmem:[#allocation6 + $0x18] sm:$0xff]  ;;  %v825_v39 = vld [vmem:[#allocation6 + $0x10] sm:$0xff] }
 0x14f   : > { %v824_v40 = vld [vmem:[#allocation6 + $0x8] sm:$0xff]  ;;  %v823_v41 = vld [vmem:[#allocation6] sm:$0xff]  ;;  %v545_v44 = vld [vmem:[%s1324_s7] sm:$0x1] }
 0x152   : > { %595 = vmatpush.bf16.msra.mxu0 %v829_v35 }
 0x153   : > { %v527_v42 = vld [vmem:[#allocation2] sm:$0x1] }
 0x154   : > { %v528_v43 = vpack.c.bf16 %v527_v42, %v527_v42 }
 0x156   : > { %596 = vmatpush.bf16.msra.mxu0 %v828_v36 }
 0x15a   : > { %597 = vmatpush.bf16.msra.mxu0 %v827_v37 }
 0x15e   : > { %598 = vmatpush.bf16.msra.mxu0 %v826_v38 }
 0x162   : > { %599 = vmatpush.bf16.msra.mxu0 %v825_v39 }
 0x166   : > { %600 = vmatpush.bf16.msra.mxu0 %v824_v40 }
 0x16a   : > { %601 = vmatpush.bf16.msra.mxu0 %v823_v41 }
 0x16d   : > { %602 = vmatmul.bf16.vlgmr.msra.gmra.mxu0 %v528_v43 }
 0x1ea   : > { %v603_v45 = vpop.f32.mrf.mxu0 }
 0x1eb   : > { %v604_v46 = vadd.f32 %v603_v45, %v545_v44 }
 0x1ed   : > { %607 = vst [vmem:[%s1255_s23] sm:$0x1] %v604_v46 }
 0x1f2   : > { %v605_v47 = vpop.f32.mrf.mxu0 }
 0x1f3 PF: > { %s617_s14 = scalar_lea.hbm %s1325_s8, %s1080_s9  ;;  %s619_s21 = sshll.u32 %s1255_s23, 4  ;;  %s620_s21 = int_to_ptr.vmem [resolvable:$true] %s619_s21 }
 0x1f4   : > { %s621_s13 = sshll.u32 %s617_s14, 4  ;;  %s609_s11 = scalar_lea.sflag [#allocation5], %s373_s10  ;;  %s622_s13 = int_to_ptr.hbm [resolvable:$true] %s621_s13 }
 0x1f5   : > { %s1004_s15 = sshra.s32 %s622_s13, 4  ;;  %s1010_s20 = scalar_lea.hbm %s1325_s8, 2  ;;  %s1005_s15 = int_to_ptr.hbm [resolvable:$true] %s1004_s15 }
 0x1f6   : > { %s1006_s16 = scalar_lea.hbm %s1005_s15, 1  ;;  %p1011_p10 = scmp.lt.s32.totalorder %s1005_s15, %s1325_s8 }
 0x1f7   : > { %p1007_p6 = scmp.ne.s32.totalorder %s1005_s15, %s1006_s16  ;;  %p1012_p11 = scmp.lt.s32.totalorder %s1010_s20, %s1006_s16 }
 0x1f9   : > { %p1008_p7 = pnand %p1007_p6, %p1195_p3  ;;  %p1013_p12 = por %p1012_p11, %p1011_p10 }
 0x1fb   : > { %p1009_p8 = pneg %p1008_p7 }
 0x1fd   : > { %p1014_p13 = pnand %p1013_p12, %p1009_p8 }
 0x1ff   : > { %1017 = shalt.err (!%p1014_p13)
}
 0x200   : > { %839 = dma.vmem_to_hbm [thread:$0]  (%p1195_p3), %s620_s21, 16, %s622_s13, %s609_s11  }
 0x201 PF: > { %p856_p0 = scmp.ge.s32.totalorder %s1092_s12, 2  ;;  %s633_s10 = sand.u32 1, %s1064_s27  }
 0x202   : > { %s634_s23 = scalar_lea.sflag [#allocation5], %s633_s10 }
 0x203   : > { %p849_p1 = pnand %p856_p0, %p1205_p9 }
 0x205   : > { %p850_p2 = pneg %p849_p1 }
 0x207   : > { %1059 = dma.done.wait (%p850_p2), %s634_s23, 16  }
 0x208   : > { %1061 = vsyncadd (%p850_p2), %s634_s23, 4294967280  ;;  %s23_s12 = sadd.s32 1, %s1092_s12   ;;  %s1340_s30 = sld [smem:[#allocation12_spill]] }
 0x209   : > { %p20_p4 = scmp.ge.s32.totalorder %s23_s12, 6   ;;  %s1341_s9 = sld [smem:[#allocation13_spill]] }
 0x20a   : > { %s1342_s10 = sld [smem:[#allocation14_spill]]  ;;  %s1344_s27 = smov %s1068_s28 }
 0x20b   : > { %s1343_s11 = sld [smem:[#allocation15_spill]]  ;;  %s1345_s28 = smov %s1072_s29 }
 0x20c   : > { %s1346_s29 = smov %s1225_s26  ;;  %22 = sbr.rel (!%p20_p4) target bundleno = 7 (0x7), region = 107 }
 0x211   :  { %639 = vsyncpa [#allocation4], 1 }
 0x212   :  { %641 = vsyncpa [#allocation4 + $0x1], 1 }
 0x213   :  { %642 = vsyncpa [#allocation7], 1 }
 0x214   :  { %643 = vsyncpa [#allocation5], 1 }
 0x215   :  { %645 = vsyncpa [#allocation5 + $0x1], 1 }

</bundles_post_ra>
